<compile_context>
chip_gen: v7x
topology: tpu7x:2x2x1
jax: 0.10.0
libtpu: 0.0.40
codegen_flags: <defaults>
</compile_context>

<pallas_src>
import jax
import jax.numpy as jnp
from jax.experimental import pallas as pl
from jax.experimental.pallas import tpu as pltpu

# ---------------- problem sizes (small, consistent with the module) ----------
B = 2            # batch
C_IN = 4         # input channels
H = W = 16       # spatial
KH = KW = 3      # conv kernel
FEAT = 32        # backbone feature width (== in_features of the replaced head)
NUM_CLASSES = 14 # nn.Linear(in_features, 14)
HW = H * W

CIN_PAD = 8                      # channel dim padded for aligned im2col columns
K_EFF = KH * KW * CIN_PAD        # 72 real contraction columns
K_PAD = 128                      # contraction depth padded to full MXU depth
F_PAD = 128                      # FEAT padded to a full lane width
C_PAD = 128                      # NUM_CLASSES padded to a full lane width


# ---------------- Pallas kernel ----------------------------------------------
def classifier_kernel(patches_ref, cw_ref, hw_ref, hb_ref, out_ref):
    # patches_ref : (B*HW, K_PAD) bf16  im2col patches (+ ones bias column at K_EFF)
    # cw_ref      : (K_PAD, F_PAD) bf16 fused conv weight (+ conv-bias row at K_EFF)
    # hw_ref      : (F_PAD, C_PAD) bf16 head weight (zero-padded)
    # hb_ref      : (1, C_PAD) f32      head bias (zero-padded)
    # out_ref     : (B, C_PAD) f32      lane-dense logits

    # Conv + bias as one full-depth MXU matmul (accumulation inside the MXU).
    feat = jnp.dot(patches_ref[...], cw_ref[...],
                   preferred_element_type=jnp.float32)        # (B*HW, F_PAD) f32
    feat = jnp.maximum(feat, 0.0)                              # ReLU (VPU)

    # Global average pool: per-batch sublane reduction (statically unrolled).
    pooled_rows = [jnp.mean(feat[b * HW:(b + 1) * HW, :], axis=0, keepdims=True)
                   for b in range(B)]
    pooled = jnp.concatenate(pooled_rows, axis=0)              # (B, F_PAD) f32

    # Replaced classifier head: Linear(FEAT -> NUM_CLASSES), lane-padded to 128.
    logits = jnp.dot(pooled.astype(jnp.bfloat16), hw_ref[...],
                     preferred_element_type=jnp.float32) + hb_ref[...]
    out_ref[...] = logits.astype(out_ref.dtype)


# ---------------- one-time parameter prep (hoisted out of the call path) -----
def prepare_params(conv_w, conv_b, head_w, head_b):
    """conv_w: (FEAT, C_IN, KH, KW), conv_b: (FEAT,),
       head_w: (NUM_CLASSES, FEAT), head_b: (NUM_CLASSES,)."""
    # Fused conv weight: row (kh*KW+kw)*CIN_PAD + c, col f = conv_w[f, c, kh, kw];
    # row K_EFF carries the conv bias (paired with the ones column in patches).
    cw = conv_w.astype(jnp.float32).transpose(2, 3, 1, 0)               # (KH, KW, C, FEAT)
    cw = jnp.pad(cw, ((0, 0), (0, 0), (0, CIN_PAD - C_IN), (0, 0)))     # (KH, KW, 8, FEAT)
    cw = cw.reshape(K_EFF, FEAT)
    cw = jnp.concatenate([cw, conv_b.astype(jnp.float32).reshape(1, FEAT)], axis=0)
    cw_fused = jnp.pad(cw, ((0, K_PAD - (K_EFF + 1)),
                            (0, F_PAD - FEAT))).astype(jnp.bfloat16)    # (K_PAD, F_PAD)

    hw_mat = jnp.pad(head_w.astype(jnp.float32).T,
                     ((0, F_PAD - FEAT),
                      (0, C_PAD - NUM_CLASSES))).astype(jnp.bfloat16)   # (F_PAD, C_PAD)
    hb_row = jnp.pad(head_b.astype(jnp.float32).reshape(1, NUM_CLASSES),
                     ((0, 0), (0, C_PAD - NUM_CLASSES)))                # (1, C_PAD) f32
    return cw_fused, hw_mat, hb_row


# ---------------- jitted forward ----------------------------------------------
@jax.jit
def multilabel_classifier_forward(x, cw_fused, hw_mat, hb_row):
    """x: NCHW float32 [B, C_IN, H, W]  ->  logits [B, NUM_CLASSES]."""
    # Lane-dense bf16 im2col patches (~128 KB), plus a ones column for the bias.
    xp = x.astype(jnp.float32).transpose(0, 2, 3, 1)                    # (B, H, W, C)
    xp = jnp.pad(xp, ((0, 0), (1, 1), (1, 1), (0, CIN_PAD - C_IN)))     # (B, H+2, W+2, 8)
    taps = [xp[:, kh:kh + H, kw:kw + W, :] for kh in range(KH) for kw in range(KW)]
    patches = jnp.concatenate(taps, axis=-1).reshape(B * HW, K_EFF)     # (512, 72)
    patches = jnp.concatenate(
        [patches,
         jnp.ones((B * HW, 1), jnp.float32),                            # bias column
         jnp.zeros((B * HW, K_PAD - K_EFF - 1), jnp.float32)], axis=-1)
    patches = patches.astype(jnp.bfloat16)                              # (512, 128) bf16

    flops = (2 * (B * HW) * K_PAD * F_PAD       # fused conv matmul
             + (B * HW) * F_PAD                 # pooling reduction
             + 2 * B * F_PAD * C_PAD)           # head matmul
    bytes_accessed = (patches.size * 2 + cw_fused.size * 2 + hw_mat.size * 2 +
                      hb_row.size * 4 + B * C_PAD * 4)

    vmem = pl.BlockSpec(memory_space=pltpu.MemorySpace.VMEM)
    out = pl.pallas_call(
        classifier_kernel,
        out_shape=jax.ShapeDtypeStruct((B, C_PAD), jnp.float32),
        in_specs=[vmem] * 4,
        out_specs=vmem,
        cost_estimate=pl.CostEstimate(flops=flops, transcendentals=0,
                                      bytes_accessed=bytes_accessed),
    )(patches, cw_fused, hw_mat, hb_row)
    return out[:, :NUM_CLASSES]


# ---------------- reference (pure JAX, f32) for a silent sanity check --------
def _reference(x, conv_w, conv_b, head_w, head_b):
    y = jax.lax.conv_general_dilated(
        x.astype(jnp.float32), conv_w.astype(jnp.float32),
        window_strides=(1, 1), padding="SAME",
        dimension_numbers=("NCHW", "OIHW", "NCHW"))
    y = jnp.maximum(y + conv_b.reshape(1, FEAT, 1, 1), 0.0)
    pooled = y.mean(axis=(2, 3))
    return pooled @ head_w.T + head_b


if __name__ == "__main__":
    key = jax.random.PRNGKey(0)
    kx, kcw, kcb, khw, khb = jax.random.split(key, 5)

    x = jax.random.normal(kx, (B, C_IN, H, W), dtype=jnp.float32)
    # deterministic synthetic parameters (no checkpoint load)
    conv_w = jax.random.normal(kcw, (FEAT, C_IN, KH, KW), dtype=jnp.float32) * 0.1
    conv_b = jax.random.normal(kcb, (FEAT,), dtype=jnp.float32) * 0.1
    head_w = jax.random.normal(khw, (NUM_CLASSES, FEAT), dtype=jnp.float32) * 0.1
    head_b = jax.random.normal(khb, (NUM_CLASSES,), dtype=jnp.float32) * 0.1

    # one-time parameter prep (hoisted out of the per-call path)
    cw_fused, hw_mat, hb_row = prepare_params(conv_w, conv_b, head_w, head_b)

    logits = multilabel_classifier_forward(x, cw_fused, hw_mat, hb_row)
    logits = jax.block_until_ready(logits)

    ref = _reference(x, conv_w, conv_b, head_w, head_b)
    assert logits.shape == (B, NUM_CLASSES)
    # bf16 MXU operands (f32 accumulation) -> tolerance loosened vs. pure-f32 ref
    err = jnp.max(jnp.abs(logits - ref))
    assert jnp.allclose(logits, ref, atol=2e-2, rtol=2e-2), f"max abs err {err}"

    print("KERNEL_OK")
</pallas_src>

<mosaic_0001>
module attributes {stable_mosaic.version = 11 : i64} {
  func.func @classifier_kernel(%arg0: memref<512x128xbf16, #tpu.memory_space<vmem>>, %arg1: memref<128x128xbf16, #tpu.memory_space<vmem>>, %arg2: memref<128x128xbf16, #tpu.memory_space<vmem>>, %arg3: memref<1x128xf32, #tpu.memory_space<vmem>>, %arg4: memref<2x128xf32, #tpu.memory_space<vmem>>) attributes {dimension_semantics = [], scalar_prefetch = 0 : i64, scratch_operands = 0 : i64, tpu.core_type = #tpu.core_type<tc>} {
    %c0 = arith.constant 0 : index
    %c0_0 = arith.constant 0 : index
    %0 = vector.load %arg0[%c0, %c0_0] : memref<512x128xbf16, #tpu.memory_space<vmem>>, vector<512x128xbf16>
    %c0_1 = arith.constant 0 : index
    %c0_2 = arith.constant 0 : index
    %1 = vector.load %arg1[%c0_1, %c0_2] : memref<128x128xbf16, #tpu.memory_space<vmem>>, vector<128x128xbf16>
    %cst = arith.constant dense<0.000000e+00> : vector<512x128xf32>
    %2 = tpu.matmul %0, %1, %cst {dimension_numbers = #tpu.dot_dimension_numbers<[1], [0], [0], [1], [0, 0, 1, 1], [], []>} : vector<512x128xbf16>, vector<128x128xbf16>, vector<512x128xf32> -> vector<512x128xf32>
    %cst_3 = arith.constant 0.000000e+00 : f32
    %3 = vector.broadcast %cst_3 : f32 to vector<512x128xf32>
    %4 = arith.maximumf %2, %3 : vector<512x128xf32>
    %5 = vector.extract_strided_slice %4 {offsets = [0, 0], sizes = [256, 128], strides = [1, 1]} : vector<512x128xf32> to vector<256x128xf32>
    %cst_4 = arith.constant dense<0.000000e+00> : vector<128xf32>
    %6 = vector.multi_reduction <add>, %5, %cst_4 [0] : vector<256x128xf32> to vector<128xf32>
    %7 = vector.shape_cast %6 : vector<128xf32> to vector<1x128xf32>
    %cst_5 = arith.constant 2.560000e+02 : f32
    %8 = vector.broadcast %cst_5 : f32 to vector<1x128xf32>
    %9 = arith.divf %7, %8 : vector<1x128xf32>
    %10 = vector.extract_strided_slice %4 {offsets = [256, 0], sizes = [256, 128], strides = [1, 1]} : vector<512x128xf32> to vector<256x128xf32>
    %cst_6 = arith.constant dense<0.000000e+00> : vector<128xf32>
    %11 = vector.multi_reduction <add>, %10, %cst_6 [0] : vector<256x128xf32> to vector<128xf32>
    %12 = vector.shape_cast %11 : vector<128xf32> to vector<1x128xf32>
    %cst_7 = arith.constant 2.560000e+02 : f32
    %13 = vector.broadcast %cst_7 : f32 to vector<1x128xf32>
    %14 = arith.divf %12, %13 : vector<1x128xf32>
    %15 = tpu.concatenate %9, %14 in 0 : vector<1x128xf32>, vector<1x128xf32> -> vector<2x128xf32>
    %16 = arith.truncf %15 : vector<2x128xf32> to vector<2x128xbf16>
    %c0_8 = arith.constant 0 : index
    %c0_9 = arith.constant 0 : index
    %17 = vector.load %arg2[%c0_8, %c0_9] : memref<128x128xbf16, #tpu.memory_space<vmem>>, vector<128x128xbf16>
    %cst_10 = arith.constant dense<0.000000e+00> : vector<2x128xf32>
    %18 = tpu.matmul %16, %17, %cst_10 {dimension_numbers = #tpu.dot_dimension_numbers<[1], [0], [0], [1], [0, 0, 1, 1], [], []>} : vector<2x128xbf16>, vector<128x128xbf16>, vector<2x128xf32> -> vector<2x128xf32>
    %c0_11 = arith.constant 0 : index
    %c0_12 = arith.constant 0 : index
    %19 = vector.load %arg3[%c0_11, %c0_12] : memref<1x128xf32, #tpu.memory_space<vmem>>, vector<1x128xf32>
    %20 = vector.broadcast %19 : vector<1x128xf32> to vector<2x128xf32>
    %21 = arith.addf %18, %20 : vector<2x128xf32>
    %c0_13 = arith.constant 0 : index
    %c0_14 = arith.constant 0 : index
    %22 = vector.load %arg4[%c0_13, %c0_14] : memref<2x128xf32, #tpu.memory_space<vmem>>, vector<2x128xf32>
    tpu.vector_store %arg4[%c0_13, %c0_14], %21 {strides = array<i32>} : memref<2x128xf32, #tpu.memory_space<vmem>>, vector<2x128xf32>,
    return
  }
}

</mosaic_0001>

<bundles_post_ra>
// kernel: multilabel_classifier_forward.1
= control target key start
LH: loop header
LB: loop body
LE: loop exit
PB: predicated region body
PF: predicated region fallthrough
CT: control target
= control target key end

     0   :  { %s1458_s0 = inlined_call_operand.vmem [shape: bf16[512,128], index: 0, kind: input, shape index: {}]   ;;  %s1459_s1 = inlined_call_operand.vmem [shape: bf16[128,128], index: 1, kind: input, shape index: {}]   ;;  %s1460_s2 = inlined_call_operand.vmem [shape: bf16[128,128], index: 2, kind: input, shape index: {}]   ;;  %s1461_s3 = inlined_call_operand.vmem [shape: f32[1,128], index: 3, kind: input, shape index: {}]   ;;  %s1462_s4 = inlined_call_operand.hbm [shape: f32[2,128], index: 4, kind: output, shape index: {}]  }
   0x1   :  { %v1115_v0 = vld [vmem:[%s1459_s1] sm:$0xff]   ;;  %v1116_v1 = vld [vmem:[%s1459_s1 + $0x8] sm:$0xff]   ;;  %v1117_v2 = vld [vmem:[%s1459_s1 + $0x10] sm:$0xff]  }
   0x2   :  { %996 = vmatprep.subr.bf16.mxu0 %v1115_v0  ;;  %1096 = vmatprep.subr.bf16.mxu1 %v1115_v0  ;;  %v1118_v3 = vld [vmem:[%s1459_s1 + $0x18] sm:$0xff]   ;;  %v1123_v4 = vld [vmem:[%s1458_s0] sm:$0xff]   ;;  %v1120_v6 = vld [vmem:[%s1459_s1 + $0x28] sm:$0xff]  }
   0x3   :  { %997 = vmatpush3.bf16.msra.mxu0 %v1115_v0  ;;  %1104 = vmatpush3.bf16.msra.mxu1 %v1115_v0  ;;  %v1119_v5 = vld [vmem:[%s1459_s1 + $0x20] sm:$0xff]   ;;  %v1121_v7 = vld [vmem:[%s1459_s1 + $0x30] sm:$0xff]   ;;  %v1122_v8 = vld [vmem:[%s1459_s1 + $0x38] sm:$0xff]  }
   0x4   :  { %998 = vmatprep.subr.bf16.mxu0 %v1116_v1  ;;  %1097 = vmatprep.subr.bf16.mxu1 %v1116_v1  ;;  %v1141_v9 = vld [vmem:[%s1458_s0 + $0x90] sm:$0xff]   ;;  %v1124_v10 = vld [vmem:[%s1458_s0 + $0x8] sm:$0xff]   ;;  %v1142_v12 = vld [vmem:[%s1458_s0 + $0x98] sm:$0xff]  }
   0x5   :  { %1012 = vmatprep.mubr.bf16.mxu0 %v1123_v4  ;;  %v1125_v11 = vld [vmem:[%s1458_s0 + $0x10] sm:$0xff]   ;;  %1048 = vmatprep.mubr.bf16.mxu1 %v1141_v9  ;;  %v1143_v13 = vld [vmem:[%s1458_s0 + $0xa0] sm:$0xff]   ;;  %v1126_v14 = vld [vmem:[%s1458_s0 + $0x18] sm:$0xff]  }
   0x6   :  { %v1127_v15 = vld [vmem:[%s1458_s0 + $0x20] sm:$0xff]   ;;  %v1144_v16 = vld [vmem:[%s1458_s0 + $0xa8] sm:$0xff]   ;;  %v1145_v17 = vld [vmem:[%s1458_s0 + $0xb0] sm:$0xff]  }
   0x7   :  { %999 = vmatpush3.bf16.msra.mxu0 %v1116_v1  ;;  %1105 = vmatpush3.bf16.msra.mxu1 %v1116_v1 }
   0x8   :  { %1000 = vmatprep.subr.bf16.mxu0 %v1117_v2  ;;  %1098 = vmatprep.subr.bf16.mxu1 %v1117_v2 }
   0xb   :  { %1001 = vmatpush3.bf16.msra.mxu0 %v1117_v2  ;;  %1106 = vmatpush3.bf16.msra.mxu1 %v1117_v2 }
   0xc   :  { %1002 = vmatprep.subr.bf16.mxu0 %v1118_v3  ;;  %1099 = vmatprep.subr.bf16.mxu1 %v1118_v3 }
   0xf   :  { %1003 = vmatpush3.bf16.msra.mxu0 %v1118_v3  ;;  %1107 = vmatpush3.bf16.msra.mxu1 %v1118_v3 }
  0x10   :  { %1004 = vmatprep.subr.bf16.mxu0 %v1119_v5  ;;  %1100 = vmatprep.subr.bf16.mxu1 %v1119_v5 }
  0x13   :  { %1005 = vmatpush3.bf16.msra.mxu0 %v1119_v5  ;;  %1108 = vmatpush3.bf16.msra.mxu1 %v1119_v5 }
  0x14   :  { %1006 = vmatprep.subr.bf16.mxu0 %v1120_v6  ;;  %1101 = vmatprep.subr.bf16.mxu1 %v1120_v6 }
  0x17   :  { %1007 = vmatpush3.bf16.msra.mxu0 %v1120_v6  ;;  %1109 = vmatpush3.bf16.msra.mxu1 %v1120_v6 }
  0x18   :  { %1008 = vmatprep.subr.bf16.mxu0 %v1121_v7  ;;  %1102 = vmatprep.subr.bf16.mxu1 %v1121_v7 }
  0x1b   :  { %1009 = vmatpush3.bf16.msra.mxu0 %v1121_v7  ;;  %1110 = vmatpush3.bf16.msra.mxu1 %v1121_v7 }
  0x1c   :  { %1010 = vmatprep.subr.bf16.mxu0 %v1122_v8  ;;  %1103 = vmatprep.subr.bf16.mxu1 %v1122_v8 }
  0x1f   :  { %1011 = vmatpush3.bf16.msra.mxu0 %v1122_v8  ;;  %1111 = vmatpush3.bf16.msra.mxu1 %v1122_v8 }
  0x22   :  { %1013 = vmatmul.mubr.bf16.vlgmr.msra.gmra.mrb[0].mxu0 %v1124_v10  ;;  %1049 = vmatmul.mubr.bf16.vlgmr.msra.gmra.mrb[0].mxu1 %v1142_v12 }
  0x23   :  { %1016 = vmatprep.mubr.bf16.mxu0 %v1125_v11  ;;  %1052 = vmatprep.mubr.bf16.mxu1 %v1143_v13 }
  0x2a   :  { %1017 = vmatmul.mubr.bf16.gmra.mrb[4].mxu0 %v1126_v14  ;;  %1053 = vmatmul.mubr.bf16.gmra.mrb[4].mxu1 %v1144_v16 }
  0x2b   :  { %1020 = vmatprep.mubr.bf16.mxu0 %v1127_v15  ;;  %1056 = vmatprep.mubr.bf16.mxu1 %v1145_v17 }
  0x2c   :  { %9 = vsyncpa [#allocation3], 0  ;;  %v1128_v18 = vld [vmem:[%s1458_s0 + $0x28] sm:$0xff]   ;;  %v1146_v19 = vld [vmem:[%s1458_s0 + $0xb8] sm:$0xff]   ;;  %v1187_v41 = vmov 0.0   ;;  %vm1188_vm0 = vmmov 0  }
  0x2d   :  { %v1129_v20 = vld [vmem:[%s1458_s0 + $0x30] sm:$0xff]   ;;  %v1147_v21 = vld [vmem:[%s1458_s0 + $0xc0] sm:$0xff]   ;;  %v1130_v22 = vld [vmem:[%s1458_s0 + $0x38] sm:$0xff]   ;;  %1076 = vmatprep.subr.bf16.mxu1 %v1187_v41  ;;  %vm769_vm1 = vcmask 1040384   ;;  %s1189_s30 = smov [#allocation2]  }
  0x2e   :  { %v1148_v23 = vld [vmem:[%s1458_s0 + $0xc8] sm:$0xff]   ;;  %v1131_v24 = vld [vmem:[%s1458_s0 + $0x40] sm:$0xff]   ;;  %v1149_v25 = vld [vmem:[%s1458_s0 + $0xd0] sm:$0xff]   ;;  %s890_s5 = sshll.u32 %s1189_s30, 4  ;;  %s891_s5 = int_to_ptr.vmem [resolvable:$true] %s890_s5 }
  0x2f   :  { %v1132_v26 = vld [vmem:[%s1458_s0 + $0x48] sm:$0xff]   ;;  %v1150_v27 = vld [vmem:[%s1458_s0 + $0xd8] sm:$0xff]   ;;  %v1133_v28 = vld [vmem:[%s1458_s0 + $0x50] sm:$0xff]   ;;  %s1163_s6 = scalar_lea.vmem %s891_s5, 32  ;;  %p1168_p1 = scmp.lt.s32.totalorder %s891_s5, %s891_s5 }
  0x30   :  { %v1151_v29 = vld [vmem:[%s1458_s0 + $0xe0] sm:$0xff]   ;;  %v1134_v30 = vld [vmem:[%s1458_s0 + $0x58] sm:$0xff]   ;;  %v1152_v31 = vld [vmem:[%s1458_s0 + $0xe8] sm:$0xff]   ;;  %p1164_p0 = scmp.ne.s32.totalorder %s891_s5, %s1163_s6  ;;  %p1169_p2 = scmp.lt.s32.totalorder %s1163_s6, %s1163_s6 }
  0x31   :  { %v1135_v32 = vld [vmem:[%s1458_s0 + $0x60] sm:$0xff]   ;;  %v1153_v33 = vld [vmem:[%s1458_s0 + $0xf0] sm:$0xff]   ;;  %v1136_v34 = vld [vmem:[%s1458_s0 + $0x68] sm:$0xff]  }
  0x32   :  { %1021 = vmatmul.mubr.bf16.gmra.mrb[8].mxu0 %v1128_v18  ;;  %1057 = vmatmul.mubr.bf16.gmra.mrb[8].mxu1 %v1146_v19  ;;  %v1154_v35 = vld [vmem:[%s1458_s0 + $0xf8] sm:$0xff]   ;;  %v1137_v36 = vld [vmem:[%s1458_s0 + $0x70] sm:$0xff]   ;;  %v1139_v38 = vld [vmem:[%s1458_s0 + $0x80] sm:$0xff]   ;;  %p1170_p3 = por %p1169_p2, %p1168_p1 }
  0x33   :  { %1024 = vmatprep.mubr.bf16.mxu0 %v1129_v20  ;;  %1060 = vmatprep.mubr.bf16.mxu1 %v1147_v21  ;;  %v1138_v37 = vld [vmem:[%s1458_s0 + $0x78] sm:$0xff]   ;;  %v1140_v39 = vld [vmem:[%s1458_s0 + $0x88] sm:$0xff]   ;;  %v1155_v40 = vld [vmem:[%s1460_s2] sm:$0xff]  }
  0x34   :  { %1077 = vmatpush3.bf16.msra.mxu1 %v1155_v40  ;;  %v1156_v42 = vld [vmem:[%s1460_s2 + $0x8] sm:$0xff]   ;;  %v1157_v43 = vld [vmem:[%s1460_s2 + $0x10] sm:$0xff]   ;;  %v1158_v44 = vld [vmem:[%s1460_s2 + $0x18] sm:$0xff]   ;;  %p1171_p4 = pnand %p1170_p3, %p1164_p0 }
  0x35   :  { %1078 = vmatprep.subr.bf16.mxu1 %v1187_v41  ;;  %v1159_v55 = vld [vmem:[%s1460_s2 + $0x20] sm:$0xff]   ;;  %v1160_v62 = vld [vmem:[%s1460_s2 + $0x28] sm:$0xff]   ;;  %v1161_v9 = vld [vmem:[%s1460_s2 + $0x30] sm:$0xff]  }
  0x36   :  { %v1162_v16 = vld [vmem:[%s1460_s2 + $0x38] sm:$0xff]  }
  0x38   :  { %1079 = vmatpush3.bf16.msra.mxu1 %v1156_v42 }
  0x39   :  { %1080 = vmatprep.subr.bf16.mxu1 %v1187_v41 }
  0x3a   :  { %1025 = vmatmul.mubr.bf16.gmra.mrb[12].mxu0 %v1130_v22  ;;  %1061 = vmatmul.mubr.bf16.gmra.mrb[12].mxu1 %v1148_v23 }
  0x3b   :  { %1028 = vmatprep.mubr.bf16.mxu0 %v1131_v24  ;;  %1064 = vmatprep.mubr.bf16.mxu1 %v1149_v25 }
  0x3c   :  { %1081 = vmatpush3.bf16.msra.mxu1 %v1157_v43 }
  0x3d   :  { %1082 = vmatprep.subr.bf16.mxu1 %v1187_v41 }
  0x40   :  { %1083 = vmatpush3.bf16.msra.mxu1 %v1158_v44 }
  0x41   :  { %1084 = vmatprep.subr.bf16.mxu1 %v1187_v41 }
  0x42   :  { %1029 = vmatmul.mubr.bf16.gmra.mrb[16].mxu0 %v1132_v26  ;;  %1065 = vmatmul.mubr.bf16.gmra.mrb[16].mxu1 %v1150_v27 }
  0x43   :  { %1032 = vmatprep.mubr.bf16.mxu0 %v1133_v28  ;;  %1068 = vmatprep.mubr.bf16.mxu1 %v1151_v29 }
  0x44   :  { %1085 = vmatpush3.bf16.msra.mxu1 %v1159_v55 }
  0x45   :  { %1086 = vmatprep.subr.bf16.mxu1 %v1187_v41 }
  0x48   :  { %1087 = vmatpush3.bf16.msra.mxu1 %v1160_v62 }
  0x49   :  { %1088 = vmatprep.subr.bf16.mxu1 %v1187_v41 }
  0x4a   :  { %1033 = vmatmul.mubr.bf16.gmra.mrb[20].mxu0 %v1134_v30  ;;  %1069 = vmatmul.mubr.bf16.gmra.mrb[20].mxu1 %v1152_v31 }
  0x4b   :  { %1036 = vmatprep.mubr.bf16.mxu0 %v1135_v32  ;;  %1072 = vmatprep.mubr.bf16.mxu1 %v1153_v33 }
  0x4c   :  { %1089 = vmatpush3.bf16.msra.mxu1 %v1161_v9 }
  0x4d   :  { %1090 = vmatprep.subr.bf16.mxu1 %v1187_v41 }
  0x50   :  { %1091 = vmatpush3.bf16.msra.mxu1 %v1162_v16 }
  0x52   :  { %1037 = vmatmul.mubr.bf16.gmra.mrb[24].mxu0 %v1136_v34  ;;  %1073 = vmatmul.mubr.bf16.gmra.mrb[24].mxu1 %v1154_v35 }
  0x53   :  { %1040 = vmatprep.mubr.bf16.mxu0 %v1137_v36  ;;  %1092 = vmatprep.mubr.msk.bf16.mxu1 %vm1188_vm0, %v1187_v41 }
  0x5a   :  { %1041 = vmatmul.mubr.bf16.gmra.mrb[28].mxu0 %v1138_v37 }
  0x5b   :  { %1044 = vmatprep.mubr.bf16.mxu0 %v1139_v38 }
  0x62   :  { %1045 = vmatmul.mubr.bf16.gmra.mrb[32].mxu0 %v1140_v39 }
  0xf5   :  { %v1014_v45 = vpop.f32.mrb[0].mxu0  ;;  %v1347_v46 = vpop.f32.mrb[0].mxu1 }
  0xf6   :  { %v373_v47 = vpop.f32.mrb[1].mxu0  ;;  %v1349_v48 = vpop.f32.mrb[1].mxu1  ;;  %v630_v56 = vmax.f32 %v1014_v45, 0.0 }
  0xf7   :  { %v1015_v49 = vpop.f32.mrb[2].mxu0  ;;  %v1351_v50 = vpop.f32.mrb[2].mxu1  ;;  %v628_v53 = vmax.f32 %v373_v47, 0.0 }
  0xf8   :  { %v376_v51 = vpop.f32.mrb[3].mxu0  ;;  %v1353_v52 = vpop.f32.mrb[3].mxu1  ;;  %v631_v58 = vmax.f32 %v1015_v49, 0.0 }
  0xf9   :  { %v629_v54 = vmax.f32 %v376_v51, 0.0 }
  0xfb   :  { %v692_v57 = vadd.f32 %v629_v54, %v628_v53 }
  0xfd   :  { %v693_v59 = vadd.f32 %v692_v57, %v630_v56  ;;  %v1018_v60 = vpop.f32.mrb[4].mxu0  ;;  %v1358_v61 = vpop.f32.mrb[4].mxu1 }
  0xfe   :  { %v389_v63 = vpop.f32.mrb[5].mxu0  ;;  %v1363_v0 = vpop.f32.mrb[5].mxu1  ;;  %v634_v10 = vmax.f32 %v1018_v60, 0.0 }
  0xff   :  { %v632_v1 = vmax.f32 %v389_v63, 0.0  ;;  %v694_v2 = vadd.f32 %v693_v59, %v631_v58  ;;  %v1019_v3 = vpop.f32.mrb[6].mxu0  ;;  %v1365_v4 = vpop.f32.mrb[6].mxu1 }
 0x100   :  { %v392_v5 = vpop.f32.mrb[7].mxu0  ;;  %v1367_v6 = vpop.f32.mrb[7].mxu1  ;;  %v635_v12 = vmax.f32 %v1019_v3, 0.0 }
 0x101   :  { %v695_v7 = vadd.f32 %v694_v2, %v632_v1  ;;  %v633_v8 = vmax.f32 %v392_v5, 0.0 }
 0x103   :  { %v696_v11 = vadd.f32 %v695_v7, %v633_v8 }
 0x105   :  { %v697_v13 = vadd.f32 %v696_v11, %v634_v10  ;;  %v1022_v14 = vpop.f32.mrb[8].mxu0  ;;  %v1372_v15 = vpop.f32.mrb[8].mxu1 }
 0x106   :  { %v405_v17 = vpop.f32.mrb[9].mxu0  ;;  %v1377_v18 = vpop.f32.mrb[9].mxu1  ;;  %v638_v27 = vmax.f32 %v1022_v14, 0.0 }
 0x107   :  { %v636_v19 = vmax.f32 %v405_v17, 0.0  ;;  %v698_v20 = vadd.f32 %v697_v13, %v635_v12  ;;  %v1023_v21 = vpop.f32.mrb[10].mxu0  ;;  %v1379_v22 = vpop.f32.mrb[10].mxu1 }
 0x108   :  { %v408_v23 = vpop.f32.mrb[11].mxu0  ;;  %v1381_v24 = vpop.f32.mrb[11].mxu1  ;;  %v639_v29 = vmax.f32 %v1023_v21, 0.0 }
 0x109   :  { %v699_v25 = vadd.f32 %v698_v20, %v636_v19  ;;  %v637_v26 = vmax.f32 %v408_v23, 0.0 }
 0x10b   :  { %v700_v28 = vadd.f32 %v699_v25, %v637_v26 }
 0x10d   :  { %v701_v30 = vadd.f32 %v700_v28, %v638_v27  ;;  %v1026_v31 = vpop.f32.mrb[12].mxu0  ;;  %v1383_v32 = vpop.f32.mrb[12].mxu1 }
 0x10e   :  { %v421_v33 = vpop.f32.mrb[13].mxu0  ;;  %v1385_v34 = vpop.f32.mrb[13].mxu1  ;;  %v642_v43 = vmax.f32 %v1026_v31, 0.0 }
 0x10f   :  { %v640_v35 = vmax.f32 %v421_v33, 0.0  ;;  %v702_v36 = vadd.f32 %v701_v30, %v639_v29  ;;  %v1027_v37 = vpop.f32.mrb[14].mxu0  ;;  %v1387_v38 = vpop.f32.mrb[14].mxu1 }
 0x110   :  { %v424_v39 = vpop.f32.mrb[15].mxu0  ;;  %v1389_v40 = vpop.f32.mrb[15].mxu1  ;;  %v643_v45 = vmax.f32 %v1027_v37, 0.0 }
 0x111   :  { %v703_v41 = vadd.f32 %v702_v36, %v640_v35  ;;  %v641_v42 = vmax.f32 %v424_v39, 0.0 }
 0x113   :  { %v704_v44 = vadd.f32 %v703_v41, %v641_v42 }
 0x115   :  { %v705_v47 = vadd.f32 %v704_v44, %v642_v43  ;;  %v1030_v49 = vpop.f32.mrb[16].mxu0  ;;  %v1391_v51 = vpop.f32.mrb[16].mxu1 }
 0x116   :  { %v437_v53 = vpop.f32.mrb[17].mxu0  ;;  %v1393_v54 = vpop.f32.mrb[17].mxu1  ;;  %v646_v1 = vmax.f32 %v1030_v49, 0.0 }
 0x117   :  { %v644_v55 = vmax.f32 %v437_v53, 0.0  ;;  %v706_v56 = vadd.f32 %v705_v47, %v643_v45  ;;  %v1031_v57 = vpop.f32.mrb[18].mxu0  ;;  %v1395_v58 = vpop.f32.mrb[18].mxu1 }
 0x118   :  { %v440_v59 = vpop.f32.mrb[19].mxu0  ;;  %v1397_v60 = vpop.f32.mrb[19].mxu1  ;;  %v647_v3 = vmax.f32 %v1031_v57, 0.0 }
 0x119   :  { %v707_v62 = vadd.f32 %v706_v56, %v644_v55  ;;  %v645_v63 = vmax.f32 %v440_v59, 0.0 }
 0x11b   :  { %v708_v2 = vadd.f32 %v707_v62, %v645_v63 }
 0x11d   :  { %v709_v5 = vadd.f32 %v708_v2, %v646_v1  ;;  %v1034_v7 = vpop.f32.mrb[20].mxu0  ;;  %v1399_v8 = vpop.f32.mrb[20].mxu1 }
 0x11e   :  { %v453_v9 = vpop.f32.mrb[21].mxu0  ;;  %v1401_v10 = vpop.f32.mrb[21].mxu1  ;;  %v650_v21 = vmax.f32 %v1034_v7, 0.0 }
 0x11f   :  { %v648_v11 = vmax.f32 %v453_v9, 0.0  ;;  %v710_v12 = vadd.f32 %v709_v5, %v647_v3  ;;  %v1035_v13 = vpop.f32.mrb[22].mxu0  ;;  %v1403_v14 = vpop.f32.mrb[22].mxu1 }
 0x120   :  { %v456_v16 = vpop.f32.mrb[23].mxu0  ;;  %v1405_v17 = vpop.f32.mrb[23].mxu1  ;;  %v651_v25 = vmax.f32 %v1035_v13, 0.0 }
 0x121   :  { %v711_v19 = vadd.f32 %v710_v12, %v648_v11  ;;  %v649_v20 = vmax.f32 %v456_v16, 0.0 }
 0x123   :  { %v712_v23 = vadd.f32 %v711_v19, %v649_v20 }
 0x125   :  { %v713_v26 = vadd.f32 %v712_v23, %v650_v21  ;;  %v1038_v27 = vpop.f32.mrb[24].mxu0  ;;  %v1407_v28 = vpop.f32.mrb[24].mxu1 }
 0x126   :  { %v469_v29 = vpop.f32.mrb[25].mxu0  ;;  %v1409_v30 = vpop.f32.mrb[25].mxu1  ;;  %v654_v43 = vmax.f32 %v1038_v27, 0.0 }
 0x127   :  { %v652_v31 = vmax.f32 %v469_v29, 0.0  ;;  %v714_v33 = vadd.f32 %v713_v26, %v651_v25  ;;  %v1039_v35 = vpop.f32.mrb[26].mxu0  ;;  %v1411_v36 = vpop.f32.mrb[26].mxu1  ;;  %v664_v26 = vmax.f32 %v1349_v48, 0.0  ;;  %v671_v48 = vmax.f32 %v1365_v4, 0.0 }
 0x128   :  { %v472_v37 = vpop.f32.mrb[27].mxu0  ;;  %v1413_v39 = vpop.f32.mrb[27].mxu1  ;;  %v655_v45 = vmax.f32 %v1039_v35, 0.0  ;;  %v678_v4 = vmax.f32 %v1383_v32, 0.0 }
 0x129   :  { %v715_v41 = vadd.f32 %v714_v33, %v652_v31  ;;  %v653_v42 = vmax.f32 %v472_v37, 0.0  ;;  %v665_v31 = vmax.f32 %v1353_v52, 0.0  ;;  %v666_v33 = vmax.f32 %v1347_v46, 0.0 }
 0x12a   :  { %v667_v37 = vmax.f32 %v1351_v50, 0.0  ;;  %v672_v52 = vmax.f32 %v1377_v18, 0.0  ;;  %v674_v50 = vmax.f32 %v1372_v15, 0.0  ;;  %v679_v18 = vmax.f32 %v1387_v38, 0.0 }
 0x12b   :  { %v716_v44 = vadd.f32 %v715_v41, %v653_v42  ;;  %v668_v42 = vmax.f32 %v1363_v0, 0.0  ;;  %v675_v0 = vmax.f32 %v1379_v22, 0.0  ;;  %v682_v22 = vmax.f32 %v1391_v51, 0.0 }
 0x12c   :  { %v686_v38 = vmax.f32 %v1399_v8, 0.0 }
 0x12d   :  { %v717_v47 = vadd.f32 %v716_v44, %v654_v43  ;;  %v1042_v49 = vpop.f32.mrb[28].mxu0 }
 0x12e   :  { %v485_v53 = vpop.f32.mrb[29].mxu0  ;;  %v658_v1 = vmax.f32 %v1042_v49, 0.0 }
 0x12f   :  { %v656_v55 = vmax.f32 %v485_v53, 0.0  ;;  %v718_v56 = vadd.f32 %v717_v47, %v655_v45  ;;  %v1043_v57 = vpop.f32.mrb[30].mxu0  ;;  %v669_v45 = vmax.f32 %v1367_v6, 0.0  ;;  %v670_v47 = vmax.f32 %v1358_v61, 0.0 }
 0x130   :  { %v488_v59 = vpop.f32.mrb[31].mxu0  ;;  %v659_v3 = vmax.f32 %v1043_v57, 0.0  ;;  %v676_v6 = vmax.f32 %v1385_v34, 0.0  ;;  %v683_v34 = vmax.f32 %v1395_v58, 0.0  ;;  %v689_v58 = vmax.f32 %v1413_v39, 0.0 }
 0x131   :  { %v719_v62 = vadd.f32 %v718_v56, %v656_v55  ;;  %v657_v63 = vmax.f32 %v488_v59, 0.0  ;;  %v673_v56 = vmax.f32 %v1381_v24, 0.0  ;;  %v680_v24 = vmax.f32 %v1393_v54, 0.0 }
 0x133   :  { %v720_v2 = vadd.f32 %v719_v62, %v657_v63  ;;  %v677_v63 = vmax.f32 %v1389_v40, 0.0  ;;  %v684_v40 = vmax.f32 %v1401_v10, 0.0  ;;  %v690_v10 = vmax.f32 %v1407_v28, 0.0 }
 0x135   :  { %v721_v5 = vadd.f32 %v720_v2, %v658_v1  ;;  %v1046_v7 = vpop.f32.mrb[32].mxu0 }
 0x136   :  { %v501_v9 = vpop.f32.mrb[33].mxu0  ;;  %v662_v20 = vmax.f32 %v1046_v7, 0.0 }
 0x137   :  { %v722_v11 = vadd.f32 %v721_v5, %v659_v3  ;;  %v1047_v12 = vpop.f32.mrb[34].mxu0  ;;  %v660_v16 = vmax.f32 %v501_v9, 0.0  ;;  %v681_v5 = vmax.f32 %v1397_v60, 0.0  ;;  %v688_v60 = vmax.f32 %v1409_v30, 0.0 }
 0x138   :  { %v504_v13 = vpop.f32.mrb[35].mxu0  ;;  %v663_v23 = vmax.f32 %v1047_v12, 0.0 }
 0x139   :  { %v661_v19 = vmax.f32 %v504_v13, 0.0  ;;  %v685_v13 = vmax.f32 %v1405_v17, 0.0  ;;  %v723_v54 = vrot.slane %v722_v11, 4  ;;  %v691_v17 = vmax.f32 %v1411_v36, 0.0  ;;  %v938_v36 = vld [vmem:[%s1461_s3] ss:$0 sm:$0xff] }
 0x13b   :  { %v731_v21 = vadd.f32 %v661_v19, %v660_v16  ;;  %v687_v19 = vmax.f32 %v1403_v14, 0.0 }
 0x13d   :  { %v732_v25 = vadd.f32 %v731_v21, %v662_v20  ;;  %v724_v21 = vadd.f32 %v723_v54, %v722_v11 }
 0x13f   :  { %v733_v27 = vadd.f32 %v732_v25, %v663_v23 }
 0x141   :  { %v734_v29 = vadd.f32 %v733_v27, %v664_v26  ;;  %v725_v26 = vrot.slane %v724_v21, 2 }
 0x143   :  { %v735_v35 = vadd.f32 %v734_v29, %v665_v31  ;;  %v726_v29 = vadd.f32 %v725_v26, %v724_v21 }
 0x145   :  { %v736_v41 = vadd.f32 %v735_v35, %v666_v33  ;;  %v727_v14 = vrot.slane %v726_v29, 1 }
 0x147   :  { %v737_v43 = vadd.f32 %v736_v41, %v667_v37  ;;  %v728_v30 = vadd.f32 %v727_v14, %v726_v29 }
 0x149   :  { %v738_v44 = vadd.f32 %v737_v43, %v668_v42  ;;  %v730_v42 = vmul.f32 0.00390625, %v728_v30 }
 0x14b   :  { %v739_v49 = vadd.f32 %v738_v44, %v669_v45 }
 0x14d   :  { %v740_v53 = vadd.f32 %v739_v49, %v670_v47 }
 0x14f   :  { %v741_v55 = vadd.f32 %v740_v53, %v671_v48 }
 0x151   :  { %v742_v46 = vadd.f32 %v741_v55, %v672_v52 }
 0x153   :  { %v743_v57 = vadd.f32 %v742_v46, %v673_v56 }
 0x155   :  { %v744_v59 = vadd.f32 %v743_v57, %v674_v50 }
 0x157   :  { %v745_v62 = vadd.f32 %v744_v59, %v675_v0 }
 0x159   :  { %v746_v61 = vadd.f32 %v745_v62, %v676_v6 }
 0x15b   :  { %v747_v1 = vadd.f32 %v746_v61, %v677_v63 }
 0x15d   :  { %v748_v2 = vadd.f32 %v747_v1, %v678_v4 }
 0x15f   :  { %v749_v3 = vadd.f32 %v748_v2, %v679_v18 }
 0x161   :  { %v750_v15 = vadd.f32 %v749_v3, %v680_v24 }
 0x163   :  { %v751_v7 = vadd.f32 %v750_v15, %v681_v5 }
 0x165   :  { %v752_v9 = vadd.f32 %v751_v7, %v682_v22 }
 0x167   :  { %v753_v12 = vadd.f32 %v752_v9, %v683_v34 }
 0x169   :  { %v754_v32 = vadd.f32 %v753_v12, %v684_v40 }
 0x16b   :  { %v755_v16 = vadd.f32 %v754_v32, %v685_v13 }
 0x16d   :  { %v756_v20 = vadd.f32 %v755_v16, %v686_v38 }
 0x16f   :  { %v757_v51 = vadd.f32 %v756_v20, %v687_v19 }
 0x171   :  { %v758_v23 = vadd.f32 %v757_v51, %v688_v60 }
 0x173   :  { %v759_v25 = vadd.f32 %v758_v23, %v689_v58 }
 0x175   :  { %v760_v27 = vadd.f32 %v759_v25, %v690_v10 }
 0x177   :  { %v761_v8 = vadd.f32 %v760_v27, %v691_v17 }
 0x179   :  { %v762_v31 = vrot.slane %v761_v8, 4 }
 0x17b   :  { %v763_v33 = vadd.f32 %v762_v31, %v761_v8 }
 0x17d   :  { %v764_v35 = vrot.slane %v763_v33, 2 }
 0x17f   :  { %v765_v37 = vadd.f32 %v764_v35, %v763_v33 }
 0x181   :  { %v766_v41 = vrot.slane %v765_v37, 1 }
 0x183   :  { %v767_v11 = vadd.f32 %v766_v41, %v765_v37 }
 0x185   :  { %v768_v39 = vmul.f32 0.00390625, %v767_v11 }
 0x187   :  { %v770_v43 = vsel %vm769_vm1, %v730_v42, %v768_v39 }
 0x188   :  { %v771_v28 = vpack.c.bf16 %v770_v43, %v770_v43 }
 0x18a   :  { %1093 = vmatmul.mubr.bf16.vlgmr.msra.gmra.mrb[28].mxu1 %v771_v28 }
 0x25d   :  { %v877_v44 = vpop.f32.mrb[28].mxu1 }
 0x25e   :  { %v878_v45 = vadd.f32 %v938_v36, %v877_v44  ;;  %v1094_v47 = vpop.f32.mrb[29].mxu1 }
 0x25f   :  { %v880_v49 = vpop.f32.mrb[30].mxu1 }
 0x260   :  { %883 = vst [vmem:[#allocation2] sm:$0x3] %v878_v45  ;;  %v1095_v48 = vpop.f32.mrb[31].mxu1 }
 0x261   :  { %1174 = shalt.err (!%p1171_p4)
}
 0x262   :  { %s1175_s3 = scalar_lea.hbm %s1462_s4, 32 }
 0x263   :  { %p1176_p5 = scmp.ne.s32.totalorder %s1462_s4, %s1175_s3  ;;  %p1179_p6 = scmp.lt.u32.totalorder %s1175_s3, %s1462_s4 }
 0x265   :  { %p1181_p7 = pnand %p1179_p6, %p1176_p5 }
 0x267   :  { %1184 = shalt.err (!%p1181_p7)
}
 0x268   :  { %893 = dma.vmem_to_hbm [thread:$0]  %s891_s5, 32, %s1462_s4, [#allocation3]  }
 0x269   :  { %1185 = dma.done.wait [#allocation3], 32  }
 0x26a   :  { %1186 = vsyncadd [#allocation3], 4294967264 }
 0x26b   :  { %897 = vsyncpa [#allocation3], 1 }

</bundles_post_ra>
